<compile_context>
chip_gen: v6e
topology: v6e:2x2x1
jax: 0.10.0
libtpu: 0.0.40
codegen_flags: <defaults>
</compile_context>

<pallas_src>
import jax
import jax.numpy as jnp
from jax.experimental import pallas as pl
from jax.experimental.pallas import tpu as pltpu


_INV_SQRT2 = 0.7071067811865476
_LANE = 128   # padded output width (lane-dense stores)


def _round_up(x, m):
    return ((x + m - 1) // m) * m


def _gelu_exact(x):
    # PyTorch nn.GELU() default = exact erf formulation (computed in f32).
    return 0.5 * x * (1.0 + jax.lax.erf(x * _INV_SQRT2))


def adynorm_head_kernel(x_ref, w1_ref, b1_ref, w2_ref, b2_ref, w3_ref, b3_ref,
                        o_ref):
    # x_ref: (TB, 768) bf16; weights bf16; biases f32; o_ref: (TB, 128) f32.
    x = x_ref[...]
    h1 = jnp.dot(x, w1_ref[...], preferred_element_type=jnp.float32)
    h1 = _gelu_exact(h1 + b1_ref[...])                       # (TB, 256) f32
    # Dropout(0.3): identity in eval mode.
    h2 = jnp.dot(h1.astype(jnp.bfloat16), w2_ref[...],
                 preferred_element_type=jnp.float32)
    h2 = _gelu_exact(h2 + b2_ref[...])                       # (TB, 64) f32
    # Dropout(0.3): identity in eval mode.
    logit = jnp.dot(h2.astype(jnp.bfloat16), w3_ref[...],
                    preferred_element_type=jnp.float32)      # (TB, 128) f32
    o_ref[...] = (logit + b3_ref[...]).astype(o_ref.dtype)


def adynorm_classification_head(cls_emb, params):
    """cls_emb: (B, 768) float32.  Returns (B, 1) float32 logits."""
    w1, b1, w2, b2, w3, b3 = params
    B, F = cls_emb.shape

    # --- batch tiling: TB multiple of 256 when B is large, else pad B to 8 ---
    if B >= 256:
        tb = 256
        b_pad = _round_up(B, tb)
    else:
        b_pad = _round_up(B, 8)
        tb = b_pad
    grid = (b_pad // tb,)

    x = cls_emb
    if b_pad != B:
        x = jnp.pad(x, ((0, b_pad - B), (0, 0)))
    x_bf16 = x.astype(jnp.bfloat16)

    # --- bf16 weights; last layer zero-padded to a lane-dense (64,128)/(1,128)
    w1b = w1.astype(jnp.bfloat16)
    w2b = w2.astype(jnp.bfloat16)
    w3p = jnp.pad(w3, ((0, 0), (0, _LANE - w3.shape[1]))).astype(jnp.bfloat16)
    b3p = jnp.pad(b3, ((0, 0), (0, _LANE - b3.shape[1])))
    b1f = b1.astype(jnp.float32)
    b2f = b2.astype(jnp.float32)
    b3f = b3p.astype(jnp.float32)

    const = lambda shape: pl.BlockSpec(shape, lambda i: tuple(0 for _ in shape))

    flops = 2 * b_pad * (768 * 256 + 256 * 64 + 64 * _LANE) \
        + 8 * b_pad * (256 + 64)
    bytes_accessed = (
        b_pad * 768 * 2                                   # x (bf16)
        + (768 * 256 + 256 * 64 + 64 * _LANE) * 2         # weights (bf16)
        + (256 + 64 + _LANE) * 4                          # biases (f32)
        + b_pad * _LANE * 4                               # output (f32)
    )
    cost = pl.CostEstimate(flops=flops,
                           transcendentals=b_pad * (256 + 64),
                           bytes_accessed=bytes_accessed)

    out_pad = pl.pallas_call(
        adynorm_head_kernel,
        out_shape=jax.ShapeDtypeStruct((b_pad, _LANE), jnp.float32),
        grid=grid,
        in_specs=[
            pl.BlockSpec((tb, F), lambda i: (i, 0)),      # activation tile
            const(w1b.shape), const(b1f.shape),
            const(w2b.shape), const(b2f.shape),
            const(w3p.shape), const(b3f.shape),
        ],
        out_specs=pl.BlockSpec((tb, _LANE), lambda i: (i, 0)),
        compiler_params=pltpu.CompilerParams(
            dimension_semantics=("parallel",)),
        cost_estimate=cost,
    )(x_bf16, w1b, b1f, w2b, b2f, w3p, b3f)

    return out_pad[:B, :1]


def init_params(key):
    """Deterministic synthetic weights matching nn.Linear shapes (transposed)."""
    k1, k2, k3 = jax.random.split(key, 3)
    w1 = jax.random.normal(k1, (768, 256), jnp.float32) * 0.02
    b1 = jnp.zeros((1, 256), jnp.float32)
    w2 = jax.random.normal(k2, (256, 64), jnp.float32) * 0.02
    b2 = jnp.zeros((1, 64), jnp.float32)
    w3 = jax.random.normal(k3, (64, 1), jnp.float32) * 0.02
    b3 = jnp.zeros((1, 1), jnp.float32)
    return (w1, b1, w2, b2, w3, b3)


def stub_encoder_cls(input_ids, embedding_table):
    """Plain-JAX stand-in for the pretrained AutoModel encoder.

    Gathers only the CLS-token embedding (no (B, S, 768) materialization).
    """
    # TODO(synk): the real pretrained transformer encoder (AutoModel) has no
    # in-script equivalent; a deterministic embedding lookup is used instead.
    ids = jnp.squeeze(input_ids, axis=1)                  # (B, S)
    cls_ids = ids[:, 0]                                   # (B,)
    return embedding_table[cls_ids]                       # (B, 768)


def _ref_head_bf16(cls_emb, params):
    """JAX reference mimicking the kernel's bf16-operand / f32-accum math."""
    w1, b1, w2, b2, w3, b3 = params
    xb = cls_emb.astype(jnp.bfloat16)
    h = jnp.dot(xb, w1.astype(jnp.bfloat16),
                preferred_element_type=jnp.float32) + b1
    h = _gelu_exact(h)
    h = jnp.dot(h.astype(jnp.bfloat16), w2.astype(jnp.bfloat16),
                preferred_element_type=jnp.float32) + b2
    h = _gelu_exact(h)
    return jnp.dot(h.astype(jnp.bfloat16), w3.astype(jnp.bfloat16),
                   preferred_element_type=jnp.float32) + b3


if __name__ == "__main__":
    key = jax.random.PRNGKey(0)
    k_tok, k_emb, k_par = jax.random.split(key, 3)

    B, S, V, H = 8, 8, 100, 768
    # pairwise_tokens['input_ids'] analogue: (B, 1, S) int32
    input_ids = jax.random.randint(k_tok, (B, 1, S), 0, V, dtype=jnp.int32)
    embedding_table = jax.random.normal(k_emb, (V, H), jnp.float32) * 0.1

    cls_emb = stub_encoder_cls(input_ids, embedding_table)     # (B, 768)
    params = init_params(k_par)

    true_logit = adynorm_classification_head(cls_emb, params)  # (B, 1)
    true_logit = jax.block_until_ready(true_logit)
    assert true_logit.shape == (B, 1)

    # Exact-precision check against a JAX ref using the same bf16/f32 mix.
    ref_bf16 = _ref_head_bf16(cls_emb, params)
    assert jnp.allclose(true_logit, ref_bf16, atol=1e-4, rtol=1e-4)

    # Loose check against the pure-f32 PyTorch-equivalent math.
    w1, b1, w2, b2, w3, b3 = params
    h = _gelu_exact(cls_emb @ w1 + b1)
    h = _gelu_exact(h @ w2 + b2)
    ref_f32 = h @ w3 + b3
    assert jnp.allclose(true_logit, ref_f32, atol=3e-2, rtol=3e-2)

    print("KERNEL_OK")
</pallas_src>

<mosaic_0001>
module attributes {stable_mosaic.version = 11 : i64} {
  func.func @adynorm_head_kernel(%arg0: i32, %arg1: memref<8x768xbf16, #tpu.memory_space<vmem>>, %arg2: memref<768x256xbf16, #tpu.memory_space<vmem>>, %arg3: memref<1x256xf32, #tpu.memory_space<vmem>>, %arg4: memref<256x64xbf16, #tpu.memory_space<vmem>>, %arg5: memref<1x64xf32, #tpu.memory_space<vmem>>, %arg6: memref<64x128xbf16, #tpu.memory_space<vmem>>, %arg7: memref<1x128xf32, #tpu.memory_space<vmem>>, %arg8: memref<8x128xf32, #tpu.memory_space<vmem>>) attributes {dimension_semantics = [#tpu.dimension_semantics<parallel>], iteration_bounds = array<i64: 1>, scalar_prefetch = 0 : i64, scratch_operands = 0 : i64, tpu.core_type = #tpu.core_type<tc>, window_params = [{transform_indices = @transform_0, window_bounds = array<i64: 8, 768>}, {pipeline_mode = #tpu.pipeline_mode<synchronous>, transform_indices = @transform_1, window_bounds = array<i64: 768, 256>}, {pipeline_mode = #tpu.pipeline_mode<synchronous>, transform_indices = @transform_2, window_bounds = array<i64: 1, 256>}, {pipeline_mode = #tpu.pipeline_mode<synchronous>, transform_indices = @transform_3, window_bounds = array<i64: 256, 64>}, {pipeline_mode = #tpu.pipeline_mode<synchronous>, transform_indices = @transform_4, window_bounds = array<i64: 1, 64>}, {pipeline_mode = #tpu.pipeline_mode<synchronous>, transform_indices = @transform_5, window_bounds = array<i64: 64, 128>}, {pipeline_mode = #tpu.pipeline_mode<synchronous>, transform_indices = @transform_6, window_bounds = array<i64: 1, 128>}, {transform_indices = @transform_7, window_bounds = array<i64: 8, 128>}]} {
    %c0 = arith.constant 0 : index
    %c0_0 = arith.constant 0 : index
    %0 = vector.load %arg1[%c0, %c0_0] : memref<8x768xbf16, #tpu.memory_space<vmem>>, vector<8x768xbf16>
    %c0_1 = arith.constant 0 : index
    %c0_2 = arith.constant 0 : index
    %1 = vector.load %arg2[%c0_1, %c0_2] : memref<768x256xbf16, #tpu.memory_space<vmem>>, vector<768x256xbf16>
    %cst = arith.constant dense<0.000000e+00> : vector<8x256xf32>
    %2 = tpu.matmul %0, %1, %cst {dimension_numbers = #tpu.dot_dimension_numbers<[1], [0], [0], [1], [0, 0, 1, 1], [], []>} : vector<8x768xbf16>, vector<768x256xbf16>, vector<8x256xf32> -> vector<8x256xf32>
    %c0_3 = arith.constant 0 : index
    %c0_4 = arith.constant 0 : index
    %3 = vector.load %arg3[%c0_3, %c0_4] : memref<1x256xf32, #tpu.memory_space<vmem>>, vector<1x256xf32>
    %4 = vector.broadcast %3 : vector<1x256xf32> to vector<8x256xf32>
    %5 = arith.addf %2, %4 : vector<8x256xf32>
    %cst_5 = arith.constant 5.000000e-01 : f32
    %6 = vector.broadcast %cst_5 : f32 to vector<8x256xf32>
    %7 = arith.mulf %6, %5 : vector<8x256xf32>
    %cst_6 = arith.constant 0.707106769 : f32
    %8 = vector.broadcast %cst_6 : f32 to vector<8x256xf32>
    %9 = arith.mulf %5, %8 : vector<8x256xf32>
    %10 = math.erf %9 : vector<8x256xf32>
    %cst_7 = arith.constant 1.000000e+00 : f32
    %11 = vector.broadcast %cst_7 : f32 to vector<8x256xf32>
    %12 = arith.addf %11, %10 : vector<8x256xf32>
    %13 = arith.mulf %7, %12 : vector<8x256xf32>
    %14 = arith.truncf %13 : vector<8x256xf32> to vector<8x256xbf16>
    %c0_8 = arith.constant 0 : index
    %c0_9 = arith.constant 0 : index
    %15 = vector.load %arg4[%c0_8, %c0_9] : memref<256x64xbf16, #tpu.memory_space<vmem>>, vector<256x64xbf16>
    %cst_10 = arith.constant dense<0.000000e+00> : vector<8x64xf32>
    %16 = tpu.matmul %14, %15, %cst_10 {dimension_numbers = #tpu.dot_dimension_numbers<[1], [0], [0], [1], [0, 0, 1, 1], [], []>} : vector<8x256xbf16>, vector<256x64xbf16>, vector<8x64xf32> -> vector<8x64xf32>
    %c0_11 = arith.constant 0 : index
    %c0_12 = arith.constant 0 : index
    %17 = vector.load %arg5[%c0_11, %c0_12] : memref<1x64xf32, #tpu.memory_space<vmem>>, vector<1x64xf32>
    %18 = vector.broadcast %17 : vector<1x64xf32> to vector<8x64xf32>
    %19 = arith.addf %16, %18 : vector<8x64xf32>
    %cst_13 = arith.constant 5.000000e-01 : f32
    %20 = vector.broadcast %cst_13 : f32 to vector<8x64xf32>
    %21 = arith.mulf %20, %19 : vector<8x64xf32>
    %cst_14 = arith.constant 0.707106769 : f32
    %22 = vector.broadcast %cst_14 : f32 to vector<8x64xf32>
    %23 = arith.mulf %19, %22 : vector<8x64xf32>
    %24 = math.erf %23 : vector<8x64xf32>
    %cst_15 = arith.constant 1.000000e+00 : f32
    %25 = vector.broadcast %cst_15 : f32 to vector<8x64xf32>
    %26 = arith.addf %25, %24 : vector<8x64xf32>
    %27 = arith.mulf %21, %26 : vector<8x64xf32>
    %28 = arith.truncf %27 : vector<8x64xf32> to vector<8x64xbf16>
    %c0_16 = arith.constant 0 : index
    %c0_17 = arith.constant 0 : index
    %29 = vector.load %arg6[%c0_16, %c0_17] : memref<64x128xbf16, #tpu.memory_space<vmem>>, vector<64x128xbf16>
    %cst_18 = arith.constant dense<0.000000e+00> : vector<8x128xf32>
    %30 = tpu.matmul %28, %29, %cst_18 {dimension_numbers = #tpu.dot_dimension_numbers<[1], [0], [0], [1], [0, 0, 1, 1], [], []>} : vector<8x64xbf16>, vector<64x128xbf16>, vector<8x128xf32> -> vector<8x128xf32>
    %c0_19 = arith.constant 0 : index
    %c0_20 = arith.constant 0 : index
    %31 = vector.load %arg7[%c0_19, %c0_20] : memref<1x128xf32, #tpu.memory_space<vmem>>, vector<1x128xf32>
    %32 = vector.broadcast %31 : vector<1x128xf32> to vector<8x128xf32>
    %33 = arith.addf %30, %32 : vector<8x128xf32>
    %c0_21 = arith.constant 0 : index
    %c0_22 = arith.constant 0 : index
    %34 = vector.load %arg8[%c0_21, %c0_22] : memref<8x128xf32, #tpu.memory_space<vmem>>, vector<8x128xf32>
    tpu.vector_store %arg8[%c0_21, %c0_22], %33 {strides = array<i32>} : memref<8x128xf32, #tpu.memory_space<vmem>>, vector<8x128xf32>,
    return
  }
  func.func @transform_0(%arg0: i32) -> (i32, i32) {
    %c0_i32 = arith.constant 0 : i32
    %c0_i32_0 = arith.constant 0 : i32
    return %arg0, %c0_i32 : i32, i32
  }
  func.func @transform_1(%arg0: i32) -> (i32, i32) {
    %c0_i32 = arith.constant 0 : i32
    %c0_i32_0 = arith.constant 0 : i32
    %c0_i32_1 = arith.constant 0 : i32
    return %c0_i32, %c0_i32_0 : i32, i32
  }
  func.func @transform_2(%arg0: i32) -> (i32, i32) {
    %c0_i32 = arith.constant 0 : i32
    %c0_i32_0 = arith.constant 0 : i32
    %c0_i32_1 = arith.constant 0 : i32
    return %c0_i32, %c0_i32_0 : i32, i32
  }
  func.func @transform_3(%arg0: i32) -> (i32, i32) {
    %c0_i32 = arith.constant 0 : i32
    %c0_i32_0 = arith.constant 0 : i32
    %c0_i32_1 = arith.constant 0 : i32
    return %c0_i32, %c0_i32_0 : i32, i32
  }
  func.func @transform_4(%arg0: i32) -> (i32, i32) {
    %c0_i32 = arith.constant 0 : i32
    %c0_i32_0 = arith.constant 0 : i32
    %c0_i32_1 = arith.constant 0 : i32
    return %c0_i32, %c0_i32_0 : i32, i32
  }
  func.func @transform_5(%arg0: i32) -> (i32, i32) {
    %c0_i32 = arith.constant 0 : i32
    %c0_i32_0 = arith.constant 0 : i32
    %c0_i32_1 = arith.constant 0 : i32
    return %c0_i32, %c0_i32_0 : i32, i32
  }
  func.func @transform_6(%arg0: i32) -> (i32, i32) {
    %c0_i32 = arith.constant 0 : i32
    %c0_i32_0 = arith.constant 0 : i32
    %c0_i32_1 = arith.constant 0 : i32
    return %c0_i32, %c0_i32_0 : i32, i32
  }
  func.func @transform_7(%arg0: i32) -> (i32, i32) {
    %c0_i32 = arith.constant 0 : i32
    %c0_i32_0 = arith.constant 0 : i32
    return %arg0, %c0_i32 : i32, i32
  }
}

</mosaic_0001>

<bundles_post_ra>
// kernel: tpu_custom_call.1
= control target key start
LH: loop header
LB: loop body
LE: loop exit
PB: predicated region body
PF: predicated region fallthrough
CT: control target
= control target key end

     0   :  { %12 = vsyncpa [#allocation3], 0  ;;  %s1595_s0 = inlined_call_operand.vmem [shape: bf16[8,768], index: 0, kind: input, shape index: {}]   ;;  %s1596_s1 = inlined_call_operand.hbm [shape: bf16[768,256], index: 1, kind: input, shape index: {}]   ;;  %s1597_s2 = inlined_call_operand.vmem [shape: f32[1,256], index: 2, kind: input, shape index: {}]   ;;  %s1598_s3 = inlined_call_operand.vmem [shape: bf16[256,64], index: 3, kind: input, shape index: {}]   ;;  %s1599_s4 = inlined_call_operand.vmem [shape: f32[1,64], index: 4, kind: input, shape index: {}]   ;;  %s1600_s5 = inlined_call_operand.vmem [shape: bf16[64,128], index: 5, kind: input, shape index: {}]   ;;  %s1601_s6 = inlined_call_operand.vmem [shape: f32[1,128], index: 6, kind: input, shape index: {}]   ;;  %s1602_s7 = inlined_call_operand.hbm [shape: f32[8,128], index: 7, kind: output, shape index: {}]  }
   0x1   :  { %13 = vsyncpa [#allocation4], 0  ;;  %s1459_s24 = smov [#allocation2]  }
   0x2   :  { %s21_s25 = sshll.u32 %s1459_s24, 4  ;;  %s22_s25 = int_to_ptr.vmem [resolvable:$true] %s21_s25 }
   0x3   :  { %s1423_s26 = scalar_lea.vmem %s22_s25, 12288  ;;  %p1428_p1 = scmp.lt.s32.totalorder %s22_s25, %s22_s25 }
   0x4   :  { %p1424_p0 = scmp.ne.s32.totalorder %s22_s25, %s1423_s26  ;;  %p1429_p2 = scmp.lt.s32.totalorder %s1423_s26, %s1423_s26 }
   0x6   :  { %p1430_p3 = por %p1429_p2, %p1428_p1 }
   0x8   :  { %p1431_p4 = pnand %p1430_p3, %p1424_p0 }
   0xa   :  { %1434 = shalt.err (!%p1431_p4)
}
   0xb   :  { %s1460_s27 = smov 128   ;;  %s1461_s28 = smov 8  }
   0xc   :  { %27 = dma.hbm_to_vmem [thread:$0]  %s1596_s1, 12288, %s22_s25, [#allocation3], %s1460_s27, %s1460_s27, %s1461_s28  }
   0xd   :  { %1455 = dma.done.wait [#allocation3], 12288  }
   0xe   :  { %1456 = vsyncadd [#allocation3], 4294955008  ;;  %v1239_v0 = vld [vmem:[#allocation2 + $0x74] ss:$8 sps:$4 sm:$0xff]   ;;  %v1241_v1 = vld [vmem:[#allocation2 + $0x70] ss:$8 sps:$4 sm:$0xff]  }
   0xf   :  { %654 = vmatprep.subr.bf16.mxu0 %v1239_v0  ;;  %v1242_v2 = vld [vmem:[#allocation2 + $0x174] ss:$8 sps:$4 sm:$0xff]   ;;  %v1244_v3 = vld [vmem:[#allocation2 + $0x170] ss:$8 sps:$4 sm:$0xff]   ;;  %v1245_v4 = vld [vmem:[#allocation2 + $0x64] ss:$8 sps:$4 sm:$0xff]  }
  0x10   :  { %655 = vmatpush1.bf16.msra.mxu0 %v1241_v1  ;;  %v1247_v5 = vld [vmem:[#allocation2 + $0x60] ss:$8 sps:$4 sm:$0xff]   ;;  %695 = vmatprep.subr.bf16.mxu1 %v1242_v2  ;;  %v1248_v6 = vld [vmem:[#allocation2 + $0x164] ss:$8 sps:$4 sm:$0xff]   ;;  %v1251_v8 = vld [vmem:[#allocation2 + $0x54] ss:$8 sps:$4 sm:$0xff]  }
  0x11   :  { %696 = vmatpush1.bf16.msra.mxu1 %v1244_v3  ;;  %656 = vmatprep.subr.bf16.mxu0 %v1245_v4  ;;  %v1250_v7 = vld [vmem:[#allocation2 + $0x160] ss:$8 sps:$4 sm:$0xff]   ;;  %v1253_v9 = vld [vmem:[#allocation2 + $0x50] ss:$8 sps:$4 sm:$0xff]   ;;  %v1254_v10 = vld [vmem:[#allocation2 + $0x154] ss:$8 sps:$4 sm:$0xff]  }
  0x12   :  { %697 = vmatprep.subr.bf16.mxu1 %v1248_v6  ;;  %v1257_v11 = vld [vmem:[#allocation2 + $0x44] ss:$8 sps:$4 sm:$0xff]   ;;  %v1256_v12 = vld [vmem:[#allocation2 + $0x150] ss:$8 sps:$4 sm:$0xff]   ;;  %v1259_v14 = vld [vmem:[#allocation2 + $0x40] ss:$8 sps:$4 sm:$0xff]  }
  0x13   :  { %v1260_v13 = vld [vmem:[#allocation2 + $0x144] ss:$8 sps:$4 sm:$0xff]   ;;  %v1263_v15 = vld [vmem:[#allocation2 + $0x34] ss:$8 sps:$4 sm:$0xff]   ;;  %v1262_v16 = vld [vmem:[#allocation2 + $0x140] ss:$8 sps:$4 sm:$0xff]  }
  0x14   :  { %657 = vmatpush1.bf16.msra.mxu0 %v1247_v5  ;;  %v1266_v17 = vld [vmem:[#allocation2 + $0x134] ss:$8 sps:$4 sm:$0xff]   ;;  %v1265_v18 = vld [vmem:[#allocation2 + $0x30] ss:$8 sps:$4 sm:$0xff]   ;;  %v1269_v19 = vld [vmem:[#allocation2 + $0x24] ss:$8 sps:$4 sm:$0xff]  }
  0x15   :  { %658 = vmatprep.subr.bf16.mxu0 %v1251_v8  ;;  %698 = vmatpush1.bf16.msra.mxu1 %v1250_v7  ;;  %v1268_v20 = vld [vmem:[#allocation2 + $0x130] ss:$8 sps:$4 sm:$0xff]   ;;  %v1272_v21 = vld [vmem:[#allocation2 + $0x124] ss:$8 sps:$4 sm:$0xff]   ;;  %v1271_v22 = vld [vmem:[#allocation2 + $0x20] ss:$8 sps:$4 sm:$0xff]  }
  0x16   :  { %699 = vmatprep.subr.bf16.mxu1 %v1254_v10  ;;  %v1275_v23 = vld [vmem:[#allocation2 + $0x14] ss:$8 sps:$4 sm:$0xff]   ;;  %v1274_v24 = vld [vmem:[#allocation2 + $0x120] ss:$8 sps:$4 sm:$0xff]   ;;  %v1277_v26 = vld [vmem:[#allocation2 + $0x10] ss:$8 sps:$4 sm:$0xff]  }
  0x17   :  { %v1278_v25 = vld [vmem:[#allocation2 + $0x114] ss:$8 sps:$4 sm:$0xff]   ;;  %v1281_v27 = vld [vmem:[#allocation2 + $0x4] ss:$8 sps:$4 sm:$0xff]   ;;  %v1280_v28 = vld [vmem:[#allocation2 + $0x110] ss:$8 sps:$4 sm:$0xff]  }
  0x18   :  { %659 = vmatpush1.bf16.msra.mxu0 %v1253_v9  ;;  %v1284_v29 = vld [vmem:[#allocation2 + $0x104] ss:$8 sps:$4 sm:$0xff]   ;;  %v1283_v30 = vld [vmem:[#allocation2] ss:$8 sps:$4 sm:$0xff]   ;;  %v1287_v31 = vld [vmem:[#allocation2 + $0xf4] ss:$8 sps:$4 sm:$0xff]  }
  0x19   :  { %660 = vmatprep.subr.bf16.mxu0 %v1257_v11  ;;  %700 = vmatpush1.bf16.msra.mxu1 %v1256_v12  ;;  %v1286_v32 = vld [vmem:[#allocation2 + $0x100] ss:$8 sps:$4 sm:$0xff]   ;;  %v1290_v33 = vld [vmem:[#allocation2 + $0x1f4] ss:$8 sps:$4 sm:$0xff]   ;;  %v1289_v34 = vld [vmem:[#allocation2 + $0xf0] ss:$8 sps:$4 sm:$0xff]  }
  0x1a   :  { %701 = vmatprep.subr.bf16.mxu1 %v1260_v13  ;;  %v1293_v35 = vld [vmem:[#allocation2 + $0xe4] ss:$8 sps:$4 sm:$0xff]   ;;  %v1292_v36 = vld [vmem:[#allocation2 + $0x1f0] ss:$8 sps:$4 sm:$0xff]   ;;  %v1295_v38 = vld [vmem:[#allocation2 + $0xe0] ss:$8 sps:$4 sm:$0xff]  }
  0x1b   :  { %v1296_v37 = vld [vmem:[#allocation2 + $0x1e4] ss:$8 sps:$4 sm:$0xff]   ;;  %v1299_v39 = vld [vmem:[#allocation2 + $0xd4] ss:$8 sps:$4 sm:$0xff]   ;;  %v1298_v40 = vld [vmem:[#allocation2 + $0x1e0] ss:$8 sps:$4 sm:$0xff]  }
  0x1c   :  { %661 = vmatpush1.bf16.msra.mxu0 %v1259_v14  ;;  %v1302_v41 = vld [vmem:[#allocation2 + $0x1d4] ss:$8 sps:$4 sm:$0xff]   ;;  %v1301_v42 = vld [vmem:[#allocation2 + $0xd0] ss:$8 sps:$4 sm:$0xff]   ;;  %v1305_v43 = vld [vmem:[#allocation2 + $0xc4] ss:$8 sps:$4 sm:$0xff]  }
  0x1d   :  { %662 = vmatprep.subr.bf16.mxu0 %v1263_v15  ;;  %702 = vmatpush1.bf16.msra.mxu1 %v1262_v16  ;;  %v1304_v44 = vld [vmem:[#allocation2 + $0x1d0] ss:$8 sps:$4 sm:$0xff]   ;;  %v1308_v45 = vld [vmem:[#allocation2 + $0x1c4] ss:$8 sps:$4 sm:$0xff]   ;;  %v1307_v47 = vld [vmem:[#allocation2 + $0xc0] ss:$8 sps:$4 sm:$0xff]  }
  0x1e   :  { %703 = vmatprep.subr.bf16.mxu1 %v1266_v17  ;;  %v42_v46 = vld [vmem:[%s1595_s0] sm:$0xff]  ;;  %v1311_v49 = vld [vmem:[#allocation2 + $0xb4] ss:$8 sps:$4 sm:$0xff]   ;;  %v43_v50 = vld [vmem:[%s1595_s0 + $0x8] sm:$0xff]  ;;  %vm1463_vm0 = vmmov 0   ;;  %vm1009_vm1 = vcmask 523264  }
  0x1f   :  { %v1070_v48 = vcombine.high %v42_v46, %v42_v46  ;;  %v1310_v51 = vld [vmem:[#allocation2 + $0x1c0] ss:$8 sps:$4 sm:$0xff]   ;;  %v1072_v52 = vcombine.high %v43_v50, %v43_v50  ;;  %v1314_v53 = vld [vmem:[#allocation2 + $0x1b4] ss:$8 sps:$4 sm:$0xff]   ;;  %v1313_v54 = vld [vmem:[#allocation2 + $0xb0] ss:$8 sps:$4 sm:$0xff]   ;;  %v1069_v5 = vcombine.low %v42_v46, %v42_v46  ;;  %v1071_v7 = vcombine.low %v43_v50, %v43_v50 }
  0x20   :  { %663 = vmatpush1.bf16.msra.mxu0 %v1265_v18  ;;  %v1317_v55 = vld [vmem:[#allocation2 + $0xa4] ss:$8 sps:$4 sm:$0xff]   ;;  %v1316_v56 = vld [vmem:[#allocation2 + $0x1b0] ss:$8 sps:$4 sm:$0xff]   ;;  %v1319_v58 = vld [vmem:[#allocation2 + $0xa0] ss:$8 sps:$4 sm:$0xff]  }
  0x21   :  { %664 = vmatprep.subr.bf16.mxu0 %v1269_v19  ;;  %704 = vmatpush1.bf16.msra.mxu1 %v1268_v20  ;;  %v1320_v57 = vld [vmem:[#allocation2 + $0x1a4] ss:$8 sps:$4 sm:$0xff]   ;;  %v1323_v59 = vld [vmem:[#allocation2 + $0x94] ss:$8 sps:$4 sm:$0xff]   ;;  %v1322_v60 = vld [vmem:[#allocation2 + $0x1a0] ss:$8 sps:$4 sm:$0xff]  }
  0x22   :  { %705 = vmatprep.subr.bf16.mxu1 %v1272_v21  ;;  %686 = vmatprep.mubr.bf16.mxu0 %v1070_v48  ;;  %v1326_v61 = vld [vmem:[#allocation2 + $0x194] ss:$8 sps:$4 sm:$0xff]   ;;  %v1325_v62 = vld [vmem:[#allocation2 + $0x90] ss:$8 sps:$4 sm:$0xff]   ;;  %v1329_v63 = vld [vmem:[#allocation2 + $0x84] ss:$8 sps:$4 sm:$0xff]  }
  0x23   :  { %727 = vmatprep.mubr.bf16.mxu1 %v1072_v52  ;;  %v1328_v0 = vld [vmem:[#allocation2 + $0x190] ss:$8 sps:$4 sm:$0xff]   ;;  %v1332_v1 = vld [vmem:[#allocation2 + $0x184] ss:$8 sps:$4 sm:$0xff]   ;;  %v1331_v2 = vld [vmem:[#allocation2 + $0x80] ss:$8 sps:$4 sm:$0xff]  }
  0x24   :  { %665 = vmatpush1.bf16.msra.mxu0 %v1271_v22  ;;  %v1339_v3 = vld [vmem:[#allocation2 + $0x274] ss:$8 sps:$4 sm:$0xff]   ;;  %v1336_v4 = vld [vmem:[#allocation2 + $0x180] ss:$8 sps:$4 sm:$0xff]   ;;  %v1337_v6 = vld [vmem:[#allocation2 + $0x270] ss:$8 sps:$4 sm:$0xff]  }
  0x25   :  { %666 = vmatprep.subr.bf16.mxu0 %v1275_v23  ;;  %706 = vmatpush1.bf16.msra.mxu1 %v1274_v24  ;;  %v1344_v8 = vld [vmem:[#allocation2 + $0x264] ss:$8 sps:$4 sm:$0xff]   ;;  %v1517_v9 = vld [vmem:[%s1595_s0 + $0x10] sm:$0xff]  ;;  %v1342_v10 = vld [vmem:[#allocation2 + $0x260] ss:$8 sps:$4 sm:$0xff]   ;;  %s1464_s30 = smov [#allocation5]  }
  0x26   :  { %707 = vmatprep.subr.bf16.mxu1 %v1278_v25  ;;  %v1074_v11 = vcombine.high %v1517_v9, %v1517_v9  ;;  %v1347_v12 = vld [vmem:[#allocation2 + $0x254] ss:$8 sps:$4 sm:$0xff]   ;;  %v1345_v13 = vld [vmem:[#allocation2 + $0x250] ss:$8 sps:$4 sm:$0xff]   ;;  %v1350_v14 = vld [vmem:[#allocation2 + $0x244] ss:$8 sps:$4 sm:$0xff]  }
  0x27   :  { %v1348_v15 = vld [vmem:[#allocation2 + $0x240] ss:$8 sps:$4 sm:$0xff]   ;;  %v1353_v16 = vld [vmem:[#allocation2 + $0x234] ss:$8 sps:$4 sm:$0xff]   ;;  %v1351_v17 = vld [vmem:[#allocation2 + $0x230] ss:$8 sps:$4 sm:$0xff]  }
  0x28   :  { %667 = vmatpush1.bf16.msra.mxu0 %v1277_v26  ;;  %v1356_v18 = vld [vmem:[#allocation2 + $0x224] ss:$8 sps:$4 sm:$0xff]   ;;  %v1354_v19 = vld [vmem:[#allocation2 + $0x220] ss:$8 sps:$4 sm:$0xff]   ;;  %v1359_v20 = vld [vmem:[#allocation2 + $0x214] ss:$8 sps:$4 sm:$0xff]  }
  0x29   :  { %668 = vmatprep.subr.bf16.mxu0 %v1281_v27  ;;  %708 = vmatpush1.bf16.msra.mxu1 %v1280_v28  ;;  %v1357_v21 = vld [vmem:[#allocation2 + $0x210] ss:$8 sps:$4 sm:$0xff]   ;;  %v1362_v22 = vld [vmem:[#allocation2 + $0x204] ss:$8 sps:$4 sm:$0xff]   ;;  %v1360_v23 = vld [vmem:[#allocation2 + $0x200] ss:$8 sps:$4 sm:$0xff]  }
  0x2a   :  { %709 = vmatprep.subr.bf16.mxu1 %v1284_v29  ;;  %v1365_v24 = vld [vmem:[#allocation2 + $0x2f4] ss:$8 sps:$4 sm:$0xff]   ;;  %v1363_v25 = vld [vmem:[#allocation2 + $0x2f0] ss:$8 sps:$4 sm:$0xff]   ;;  %v1368_v26 = vld [vmem:[#allocation2 + $0x2e4] ss:$8 sps:$4 sm:$0xff]  }
  0x2b   :  { %v1366_v27 = vld [vmem:[#allocation2 + $0x2e0] ss:$8 sps:$4 sm:$0xff]   ;;  %v1371_v28 = vld [vmem:[#allocation2 + $0x2d4] ss:$8 sps:$4 sm:$0xff]   ;;  %v1369_v29 = vld [vmem:[#allocation2 + $0x2d0] ss:$8 sps:$4 sm:$0xff]  }
  0x2c   :  { %669 = vmatpush1.bf16.msra.mxu0 %v1283_v30  ;;  %v1374_v30 = vld [vmem:[#allocation2 + $0x2c4] ss:$8 sps:$4 sm:$0xff]   ;;  %v1398_v50 = vld [vmem:[%s1598_s3 + $0x18] sm:$0xff]   ;;  %v1400_v52 = vld [vmem:[%s1598_s3 + $0x10] sm:$0xff]  }
  0x2d   :  { %670 = vmatprep.subr.bf16.mxu0 %v1287_v31  ;;  %710 = vmatpush1.bf16.msra.mxu1 %v1286_v32  ;;  %v1372_v31 = vld [vmem:[#allocation2 + $0x2c0] ss:$8 sps:$4 sm:$0xff]   ;;  %v1377_v32 = vld [vmem:[#allocation2 + $0x2b4] ss:$8 sps:$4 sm:$0xff]  }
  0x2e   :  { %711 = vmatprep.subr.bf16.mxu1 %v1290_v33  ;;  %v1375_v33 = vld [vmem:[#allocation2 + $0x2b0] ss:$8 sps:$4 sm:$0xff]   ;;  %v1394_v46 = vld [vmem:[%s1598_s3 + $0x28] sm:$0xff]   ;;  %v1396_v48 = vld [vmem:[%s1598_s3 + $0x20] sm:$0xff]  }
  0x30   :  { %671 = vmatpush2.bf16.msra.mxu0 %v1289_v34  ;;  %v1380_v34 = vld [vmem:[#allocation2 + $0x2a4] ss:$8 sps:$4 sm:$0xff]  }
  0x31   :  { %672 = vmatprep.subr.bf16.mxu0 %v1293_v35  ;;  %712 = vmatpush2.bf16.msra.mxu1 %v1292_v36  ;;  %v1378_v35 = vld [vmem:[#allocation2 + $0x2a0] ss:$8 sps:$4 sm:$0xff]   ;;  %v1383_v36 = vld [vmem:[#allocation2 + $0x294] ss:$8 sps:$4 sm:$0xff]  }
  0x32   :  { %713 = vmatprep.subr.bf16.mxu1 %v1296_v37  ;;  %v1381_v37 = vld [vmem:[#allocation2 + $0x290] ss:$8 sps:$4 sm:$0xff]  }
  0x34   :  { %673 = vmatpush2.bf16.msra.mxu0 %v1295_v38  ;;  %v1386_v38 = vld [vmem:[#allocation2 + $0x284] ss:$8 sps:$4 sm:$0xff]  }
  0x35   :  { %674 = vmatprep.subr.bf16.mxu0 %v1299_v39  ;;  %714 = vmatpush2.bf16.msra.mxu1 %v1298_v40  ;;  %v1384_v39 = vld [vmem:[#allocation2 + $0x280] ss:$8 sps:$4 sm:$0xff]   ;;  %v1073_v40 = vcombine.low %v1517_v9, %v1517_v9 }
  0x36   :  { %715 = vmatprep.subr.bf16.mxu1 %v1302_v41  ;;  %v1389_v41 = vld [vmem:[%s1598_s3 + $0x78] sm:$0xff]  }
  0x38   :  { %675 = vmatpush2.bf16.msra.mxu0 %v1301_v42  ;;  %v1390_v42 = vld [vmem:[%s1598_s3 + $0x38] sm:$0xff]  }
  0x39   :  { %676 = vmatprep.subr.bf16.mxu0 %v1305_v43  ;;  %716 = vmatpush2.bf16.msra.mxu1 %v1304_v44  ;;  %v1391_v43 = vld [vmem:[%s1598_s3 + $0x70] sm:$0xff]  }
  0x3a   :  { %717 = vmatprep.subr.bf16.mxu1 %v1308_v45  ;;  %v1392_v44 = vld [vmem:[%s1598_s3 + $0x30] sm:$0xff]   ;;  %v1393_v45 = vld [vmem:[%s1598_s3 + $0x68] sm:$0xff]  }
  0x3c   :  { %677 = vmatpush2.bf16.msra.mxu0 %v1307_v47  ;;  %v1395_v47 = vld [vmem:[%s1598_s3 + $0x60] sm:$0xff]  }
  0x3d   :  { %678 = vmatprep.subr.bf16.mxu0 %v1311_v49  ;;  %718 = vmatpush2.bf16.msra.mxu1 %v1310_v51  ;;  %v1397_v49 = vld [vmem:[%s1598_s3 + $0x58] sm:$0xff]   ;;  %v1399_v51 = vld [vmem:[%s1598_s3 + $0x50] sm:$0xff]  }
  0x3e   :  { %719 = vmatprep.subr.bf16.mxu1 %v1314_v53  ;;  %v1401_v53 = vld [vmem:[%s1598_s3 + $0x48] sm:$0xff]  }
  0x40   :  { %679 = vmatpush2.bf16.msra.mxu0 %v1313_v54  ;;  %v1402_v54 = vld [vmem:[%s1598_s3 + $0x8] sm:$0xff]  }
  0x41   :  { %680 = vmatprep.subr.bf16.mxu0 %v1317_v55  ;;  %720 = vmatpush2.bf16.msra.mxu1 %v1316_v56  ;;  %v1403_v55 = vld [vmem:[%s1598_s3 + $0x40] sm:$0xff]  }
  0x42   :  { %721 = vmatprep.subr.bf16.mxu1 %v1320_v57  ;;  %v1404_v56 = vld [vmem:[%s1598_s3] sm:$0xff]  }
  0x44   :  { %681 = vmatpush2.bf16.msra.mxu0 %v1319_v58 }
  0x45   :  { %682 = vmatprep.subr.bf16.mxu0 %v1323_v59  ;;  %722 = vmatpush2.bf16.msra.mxu1 %v1322_v60 }
  0x46   :  { %723 = vmatprep.subr.bf16.mxu1 %v1326_v61 }
  0x48   :  { %683 = vmatpush2.bf16.msra.mxu0 %v1325_v62 }
  0x49   :  { %684 = vmatprep.subr.bf16.mxu0 %v1329_v63  ;;  %724 = vmatpush2.bf16.msra.mxu1 %v1328_v0 }
  0x4a   :  { %725 = vmatprep.subr.bf16.mxu1 %v1332_v1  ;;  %v143_v1 = vlaneseq }
  0x4c   :  { %685 = vmatpush2.bf16.msra.mxu0 %v1331_v2  ;;  %v144_v2 = vshrl.u32 %v143_v1, 7 }
  0x4d   :  { %736 = vmatprep.subr.bf16.mxu0 %v1339_v3  ;;  %726 = vmatpush2.bf16.msra.mxu1 %v1336_v4  ;;  %v141_v4 = vld [vmem:[%s1597_s2] sm:$0x3] }
  0x4e   :  { %1194 = vmatprep.subr.bf16.mxu1 %v1389_v41  ;;  %v145_v3 = vsub.s32 0, %v144_v2 }
  0x4f   :  { %687 = vmatmul.mubr.bf16.vlgmr.msra.gmra.mxu0 %v1069_v5  ;;  %v149_v5 = vsub.s32 1, %v144_v2 }
  0x50   :  { %737 = vmatpush1.bf16.msra.mxu0 %v1337_v6  ;;  %768 = vmatprep.mubr.bf16.mxu0 %v1074_v11  ;;  %v146_v6 = vrot.slane %v141_v4, %v145_v3 }
  0x51   :  { %728 = vmatmul.mubr.bf16.vlgmr.msra.gmra.mxu1 %v1071_v7  ;;  %738 = vmatprep.subr.bf16.mxu0 %v1344_v8  ;;  %v150_v7 = vrot.slane %v141_v4, %v149_v5 }
  0x52   :  { %1195 = vmatpush3.bf16.msra.mxu1 %v1390_v42 }
  0x53   :  { %1196 = vmatprep.subr.bf16.mxu1 %v1391_v43 }
  0x54   :  { %739 = vmatpush1.bf16.msra.mxu0 %v1342_v10 }
  0x55   :  { %740 = vmatprep.subr.bf16.mxu0 %v1347_v12 }
  0x56   :  { %1197 = vmatpush3.bf16.msra.mxu1 %v1392_v44 }
  0x57   :  { %1198 = vmatprep.subr.bf16.mxu1 %v1393_v45 }
  0x58   :  { %741 = vmatpush1.bf16.msra.mxu0 %v1345_v13 }
  0x59   :  { %742 = vmatprep.subr.bf16.mxu0 %v1350_v14 }
  0x5a   :  { %1199 = vmatpush3.bf16.msra.mxu1 %v1394_v46 }
  0x5b   :  { %1200 = vmatprep.subr.bf16.mxu1 %v1395_v47 }
  0x5c   :  { %743 = vmatpush1.bf16.msra.mxu0 %v1348_v15 }
  0x5d   :  { %744 = vmatprep.subr.bf16.mxu0 %v1353_v16 }
  0x5e   :  { %1201 = vmatpush3.bf16.msra.mxu1 %v1396_v48  ;;  %v1188_v48 = vld [vmem:[%s1601_s6] ss:$0 sm:$0xff] }
  0x5f   :  { %1202 = vmatprep.subr.bf16.mxu1 %v1397_v49 }
  0x60   :  { %745 = vmatpush1.bf16.msra.mxu0 %v1351_v17 }
  0x61   :  { %746 = vmatprep.subr.bf16.mxu0 %v1356_v18 }
  0x62   :  { %1203 = vmatpush3.bf16.msra.mxu1 %v1398_v50 }
  0x63   :  { %1204 = vmatprep.subr.bf16.mxu1 %v1399_v51 }
  0x64   :  { %747 = vmatpush1.bf16.msra.mxu0 %v1354_v19 }
  0x65   :  { %748 = vmatprep.subr.bf16.mxu0 %v1359_v20 }
  0x66   :  { %1205 = vmatpush3.bf16.msra.mxu1 %v1400_v52 }
  0x67   :  { %1206 = vmatprep.subr.bf16.mxu1 %v1401_v53 }
  0x68   :  { %749 = vmatpush1.bf16.msra.mxu0 %v1357_v21 }
  0x69   :  { %750 = vmatprep.subr.bf16.mxu0 %v1362_v22 }
  0x6a   :  { %1207 = vmatpush3.bf16.msra.mxu1 %v1402_v54 }
  0x6b   :  { %1208 = vmatprep.subr.bf16.mxu1 %v1403_v55 }
  0x6c   :  { %751 = vmatpush1.bf16.msra.mxu0 %v1360_v23 }
  0x6d   :  { %752 = vmatprep.subr.bf16.mxu0 %v1365_v24 }
  0x6e   :  { %1209 = vmatpush3.bf16.msra.mxu1 %v1404_v56 }
  0x70   :  { %753 = vmatpush2.bf16.msra.mxu0 %v1363_v25 }
  0x71   :  { %754 = vmatprep.subr.bf16.mxu0 %v1368_v26 }
  0x74   :  { %755 = vmatpush2.bf16.msra.mxu0 %v1366_v27 }
  0x75   :  { %756 = vmatprep.subr.bf16.mxu0 %v1371_v28 }
  0x78   :  { %757 = vmatpush2.bf16.msra.mxu0 %v1369_v29 }
  0x79   :  { %758 = vmatprep.subr.bf16.mxu0 %v1374_v30  ;;  %v1405_v30 = vld [vmem:[%s1600_s5 + $0x18] sm:$0xff]  }
  0x7c   :  { %759 = vmatpush2.bf16.msra.mxu0 %v1372_v31  ;;  %v1462_v31 = vmov 0.0  }
  0x7d   :  { %760 = vmatprep.subr.bf16.mxu0 %v1377_v32  ;;  %1221 = vmatprep.subr.bf16.mxu1 %v1462_v31  ;;  %v1406_v32 = vld [vmem:[%s1600_s5 + $0x10] sm:$0xff]  }
  0x80   :  { %761 = vmatpush2.bf16.msra.mxu0 %v1375_v33  ;;  %v1407_v33 = vld [vmem:[%s1600_s5 + $0x8] sm:$0xff]  }
  0x81   :  { %762 = vmatprep.subr.bf16.mxu0 %v1380_v34  ;;  %v1408_v34 = vld [vmem:[%s1600_s5] sm:$0xff]  }
  0x84   :  { %763 = vmatpush2.bf16.msra.mxu0 %v1378_v35 }
  0x85   :  { %764 = vmatprep.subr.bf16.mxu0 %v1383_v36  ;;  %v1171_v36 = vld [vmem:[%s1599_s4] ss:$0 sm:$0xff]  ;;  %s1060_s4 = sshll.u32 %s1464_s30, 4  ;;  %s1061_s4 = int_to_ptr.vmem [resolvable:$true] %s1060_s4 }
  0x86   :  { %s1435_s1 = scalar_lea.vmem %s1061_s4, 128  ;;  %p1440_p6 = scmp.lt.s32.totalorder %s1061_s4, %s1061_s4 }
  0x87   :  { %p1436_p5 = scmp.ne.s32.totalorder %s1061_s4, %s1435_s1  ;;  %p1441_p7 = scmp.lt.s32.totalorder %s1435_s1, %s1435_s1 }
  0x88   :  { %765 = vmatpush2.bf16.msra.mxu0 %v1381_v37 }
  0x89   :  { %766 = vmatprep.subr.bf16.mxu0 %v1386_v38  ;;  %p1442_p8 = por %p1441_p7, %p1440_p6 }
  0x8b   :  { %p1443_p9 = pnand %p1442_p8, %p1436_p5 }
  0x8c   :  { %767 = vmatpush2.bf16.msra.mxu0 %v1384_v39 }
  0x8f   :  { %769 = vmatmul.mubr.bf16.vlgmr.msra.gmra.mxu0 %v1073_v40 }
 0x10f   :  { %v688_v57 = vpop.f32.mrf.mxu0 }
 0x110   :  { %v689_v8 = vadd.f32 %v688_v57, %v146_v6 }
 0x111   :  { %v690_v58 = vpop.f32.mrf.mxu0  ;;  %v729_v59 = vpop.f32.mrf.mxu1 }
 0x112   :  { %v691_v9 = vadd.f32 %v690_v58, %v150_v7  ;;  %v730_v10 = vadd.f32 %v729_v59, %v689_v8 }
 0x113   :  { %v692_v60 = vpop.f32.mrf.mxu0  ;;  %v731_v61 = vpop.f32.mrf.mxu1 }
 0x114   :  { %v732_v12 = vadd.f32 %v731_v61, %v691_v9 }
 0x115   :  { %v693_v62 = vpop.f32.mrf.mxu0  ;;  %v733_v63 = vpop.f32.mrf.mxu1 }
 0x117   :  { %v734_v0 = vpop.f32.mrf.mxu1 }
 0x14f   :  { %v770_v11 = vpop.f32.mrf.mxu0 }
 0x150   :  { %v771_v13 = vadd.f32 %v770_v11, %v730_v10 }
 0x151   :  { %v772_v14 = vpop.f32.mrf.mxu0 }
 0x152   :  { %v779_v15 = vmul.f32 0.70710677, %v771_v13  ;;  %v773_v16 = vadd.f32 %v772_v14, %v732_v12  ;;  %v777_v23 = vmul.f32 0.5, %v771_v13 }
 0x153   :  { %v774_v17 = vpop.f32.mrf.mxu0 }
 0x154   :  { %1409 = verf.f32 %v779_v15  ;;  %v780_v18 = vmul.f32 0.70710677, %v773_v16  ;;  %v778_v24 = vmul.f32 0.5, %v773_v16 }
 0x155   :  { %v775_v19 = vpop.f32.mrf.mxu0 }
 0x156   :  { %1411 = verf.f32 %v780_v18 }
 0x161   :  { %v1410_v20 = vpop.eup %1409 }
 0x162   :  { %v783_v21 = vadd.f32 1.0, %v1410_v20 }
 0x163   :  { %v1412_v22 = vpop.eup %1411 }
 0x164   :  { %v784_v25 = vadd.f32 1.0, %v1412_v22  ;;  %v785_v26 = vmul.f32 %v783_v21, %v777_v23 }
 0x166   :  { %v786_v27 = vmul.f32 %v784_v25, %v778_v24  ;;  %v787_v29 = vpack.c.bf16 %v785_v26, %v785_v26 }
 0x168   :  { %v788_v28 = vpack.c.bf16 %v786_v27, %v786_v27 }
 0x16a   :  { %956 = vmatprep.mubr.bf16.mxu1 %v788_v28 }
 0x16b   :  { %957 = vmatmul.mubr.bf16.vlgmr.msra.gmra.mxu1 %v787_v29 }
 0x16c   :  { %1222 = vmatpush3.bf16.msra.mxu1 %v1405_v30  ;;  %1229 = vmatprep.mubr.msk.bf16.mxu1 %vm1463_vm0, %v1462_v31 }
 0x16d   :  { %1223 = vmatprep.subr.bf16.mxu1 %v1462_v31 }
 0x170   :  { %1224 = vmatpush3.bf16.msra.mxu1 %v1406_v32 }
 0x171   :  { %1225 = vmatprep.subr.bf16.mxu1 %v1462_v31 }
 0x174   :  { %1226 = vmatpush3.bf16.msra.mxu1 %v1407_v33 }
 0x175   :  { %1227 = vmatprep.subr.bf16.mxu1 %v1462_v31 }
 0x178   :  { %1228 = vmatpush3.bf16.msra.mxu1 %v1408_v34 }
 0x22b   :  { %v1210_v35 = vpop.f32.mrf.mxu1 }
 0x22d   :  { %v1211_v37 = vpop.f32.mrf.mxu1 }
 0x22e   :  { %v1212_v38 = vadd.f32 %v1211_v37, %v1210_v35 }
 0x22f   :  { %v1213_v39 = vpop.f32.mrf.mxu1 }
 0x230   :  { %v959_v40 = vadd.f32 %v1212_v38, %v1171_v36 }
 0x231   :  { %v1214_v41 = vpop.f32.mrf.mxu1 }
 0x232   :  { %v965_v42 = vmul.f32 0.70710677, %v959_v40  ;;  %v964_v44 = vmul.f32 0.5, %v959_v40 }
 0x234   :  { %1413 = verf.f32 %v965_v42 }
 0x241   :  { %v1414_v43 = vpop.eup %1413 }
 0x242   :  { %v967_v45 = vadd.f32 1.0, %v1414_v43 }
 0x244   :  { %v968_v46 = vmul.f32 %v967_v45, %v964_v44 }
 0x246   :  { %v969_v47 = vpack.c.bf16 %v968_v46, %v968_v46 }
 0x248   :  { %1230 = vmatmul.mubr.msk.bf16.vlgmr.msra.gmra.mxu1 %vm1009_vm1, %v969_v47 }
 0x308   :  { %v1047_v49 = vpop.f32.mrf.mxu1 }
 0x309   :  { %v1048_v50 = vadd.f32 %v1188_v48, %v1047_v49 }
 0x30a   :  { %v1231_v51 = vpop.f32.mrf.mxu1 }
 0x30b   :  { %1053 = vst [vmem:[#allocation5] sm:$0xff] %v1048_v50 }
 0x30c   :  { %v1050_v52 = vpop.f32.mrf.mxu1 }
 0x30d   :  { %1446 = shalt.err (!%p1443_p9)
}
 0x30e   :  { %1063 = dma.vmem_to_hbm [thread:$0]  %s1061_s4, 128, %s1602_s7, [#allocation4]   ;;  %v1232_v53 = vpop.f32.mrf.mxu1 }
 0x30f   :  { %1457 = dma.done.wait [#allocation4], 128  }
 0x310   :  { %1458 = vsyncadd [#allocation4], 4294967168 }
 0x311   :  { %1067 = vsyncpa [#allocation3], 1 }
 0x312   :  { %1068 = vsyncpa [#allocation4], 1 }

</bundles_post_ra>
